<compile_context>
chip_gen: v7x
topology: tpu7x:2x2x1
jax: 0.10.0
libtpu: 0.0.40
codegen_flags: <defaults>
</compile_context>

<pallas_src>
import jax
import jax.numpy as jnp
from jax.experimental import pallas as pl
from jax.experimental.pallas import tpu as pltpu


def _round_up(x, m):
    return ((x + m - 1) // m) * m


# ---------------------------------------------------------------------------
# Kernel factory
# ---------------------------------------------------------------------------
def make_pc_mlp_kernel(layer_num, norm, K, class_num, eps=1e-5):
    """Ref order (all VMEM blocks):
      f_tile (TILE_B, feat0),
      [W_i (in,out), b_i (1,out), (gamma_i (1,out), beta_i (1,out) if norm)] * layer_num,
      W_final (in, 3K), b_final (1, 3K),
      (W_cls (in, C*K), b_cls (1, C*K), seg_mat (C*K, C*K)   if class_num != 0),
      outputs: pc_ref (TILE_B, 3K) [, cls_ref (TILE_B, C*K)]
    """

    def kernel(*refs):
        idx = 0
        x = refs[idx][...]
        idx += 1

        # MLP trunk: Linear -> (LayerNorm) -> LeakyReLU(0.2)
        for _ in range(layer_num):
            w = refs[idx][...]
            b = refs[idx + 1][...]
            idx += 2
            x = jnp.dot(x, w, preferred_element_type=jnp.float32) + b
            if norm:
                g = refs[idx][...]
                be = refs[idx + 1][...]
                idx += 2
                # Fused LN statistics: E[x] and E[x^2] in one data pass.
                mu = jnp.mean(x, axis=-1, keepdims=True)
                ex2 = jnp.mean(x * x, axis=-1, keepdims=True)
                var = ex2 - mu * mu
                x = (x - mu) * jax.lax.rsqrt(var + eps) * g + be
            # LeakyReLU(0.2) == max(x, 0.2*x) for slope < 1 (single VALU max).
            x = jnp.maximum(x, 0.2 * x)

        # final_fc -> pc (TILE_B, 3*K), lane-contiguous output.
        wf = refs[idx][...]
        bf = refs[idx + 1][...]
        idx += 2
        pc = jnp.dot(x, wf, preferred_element_type=jnp.float32) + bf

        if class_num != 0:
            wc = refs[idx][...]
            bc = refs[idx + 1][...]
            seg_mat = refs[idx + 2][...]
            idx += 3
            pc_ref = refs[idx]
            cls_ref = refs[idx + 1]

            cls = jnp.dot(x, wc, preferred_element_type=jnp.float32) + bc  # (B, C*K)

            # Per-K softmax without per-K slicing:
            #  - subtract the per-row GLOBAL max (softmax is shift-invariant per
            #    segment, so the result is identical and still overflow-safe),
            #  - per-segment sums via one matmul against a constant
            #    block-diagonal ones matrix (MXU, otherwise idle here),
            #  - EUP approx reciprocal + one Newton step instead of a divide.
            m = jnp.max(cls, axis=-1, keepdims=True)
            e = jnp.exp(cls - m)
            seg_sum = jnp.dot(e, seg_mat, preferred_element_type=jnp.float32)
            r = pl.reciprocal(seg_sum, approx=True)
            r = r * (2.0 - seg_sum * r)   # Newton refinement -> ~f32 accuracy

            pc_ref[...] = pc
            cls_ref[...] = e * r
        else:
            pc_ref = refs[idx]
            pc_ref[...] = pc

    return kernel


# ---------------------------------------------------------------------------
# Parameter init (nn.Linear / nn.LayerNorm style), already in kernel layout:
#   W: (in, out), b / gamma / beta: (1, out)  -> no per-call transpose/reshape.
# ---------------------------------------------------------------------------
def init_params(key, feat_channels, K, class_num, norm):
    def linear(k, fan_in, fan_out):
        k1, k2 = jax.random.split(k)
        bound = 1.0 / (fan_in ** 0.5)
        w = jax.random.uniform(k1, (fan_in, fan_out), jnp.float32, -bound, bound)
        b = jax.random.uniform(k2, (1, fan_out), jnp.float32, -bound, bound)
        return w, b

    layer_num = len(feat_channels) - 1
    keys = jax.random.split(key, layer_num + 2)
    params = {"fc": [], "ln": [], "final": None, "cls": None}
    for i in range(layer_num):
        params["fc"].append(linear(keys[i], feat_channels[i], feat_channels[i + 1]))
        if norm:
            d = feat_channels[i + 1]
            params["ln"].append((jnp.ones((1, d), jnp.float32),
                                 jnp.zeros((1, d), jnp.float32)))
    params["final"] = linear(keys[layer_num], feat_channels[-1], 3 * K)
    if class_num != 0:
        params["cls"] = linear(keys[layer_num + 1], feat_channels[-1], class_num * K)
    return params


# ---------------------------------------------------------------------------
# Wrapper
# ---------------------------------------------------------------------------
def pc_mlp_forward(f, params, feat_channels, K, class_num, norm, *, tile_b=256):
    layer_num = len(feat_channels) - 1
    B, in_feat = f.shape
    assert in_feat == feat_channels[0]
    C = class_num

    # Batch tiling: grid over batch tiles, weights resident across all steps.
    TILE_B = _round_up(min(tile_b, _round_up(max(B, 1), 8)), 8)
    B_pad = _round_up(B, TILE_B)
    if B_pad != B:
        f = jnp.pad(f, ((0, B_pad - B), (0, 0)))
    grid = (B_pad // TILE_B,)

    def resident(arr):  # whole array, same block every grid step (fetched once)
        return pl.BlockSpec(arr.shape, lambda i: (0,) * arr.ndim)

    inputs = [f]
    in_specs = [pl.BlockSpec((TILE_B, in_feat), lambda i: (i, 0))]
    for i in range(layer_num):
        w, b = params["fc"][i]
        inputs += [w, b]
        in_specs += [resident(w), resident(b)]
        if norm:
            g, be = params["ln"][i]
            inputs += [g, be]
            in_specs += [resident(g), resident(be)]
    wf, bf = params["final"]
    inputs += [wf, bf]
    in_specs += [resident(wf), resident(bf)]

    if C != 0:
        wc, bc = params["cls"]
        # Block-diagonal ones: (exp @ seg_mat)[:, j] = sum of j's own K-segment.
        seg_mat = jnp.kron(jnp.eye(K, dtype=jnp.float32),
                           jnp.ones((C, C), dtype=jnp.float32))
        inputs += [wc, bc, seg_mat]
        in_specs += [resident(wc), resident(bc), resident(seg_mat)]
        out_shape = (jax.ShapeDtypeStruct((B_pad, 3 * K), jnp.float32),
                     jax.ShapeDtypeStruct((B_pad, C * K), jnp.float32))
        out_specs = (pl.BlockSpec((TILE_B, 3 * K), lambda i: (i, 0)),
                     pl.BlockSpec((TILE_B, C * K), lambda i: (i, 0)))
    else:
        out_shape = jax.ShapeDtypeStruct((B_pad, 3 * K), jnp.float32)
        out_specs = pl.BlockSpec((TILE_B, 3 * K), lambda i: (i, 0))

    # VMEM budget: resident params + double-buffered IO tiles + live activations.
    param_bytes = sum(int(a.size) * a.dtype.itemsize for a in inputs[1:])
    io_bytes = 2 * 2 * TILE_B * (in_feat + 3 * K + C * K) * 4
    act_bytes = 4 * TILE_B * max(list(feat_channels) + [3 * K, max(C * K, 1)]) * 4
    vmem_limit = int(min(48 * 1024 * 1024,                       # v7x-safe (64 MiB phys)
                         max(param_bytes + io_bytes + act_bytes + (2 << 20),
                             32 * 1024 * 1024)))

    kernel = make_pc_mlp_kernel(layer_num, norm, K, class_num)

    out = pl.pallas_call(
        kernel,
        grid=grid,
        in_specs=in_specs,
        out_specs=out_specs,
        out_shape=out_shape,
        compiler_params=pltpu.CompilerParams(
            dimension_semantics=("parallel",),   # megacore: split batch tiles on v7x
            vmem_limit_bytes=vmem_limit),
    )(*inputs)

    # Plain-JAX glue: drop batch padding, reshape, interleave pc / softmax.
    if C != 0:
        pc_flat, cls_flat = out
        pc = pc_flat[:B].reshape(B, K, 3)
        cls = cls_flat[:B].reshape(B, K, C)
        return jnp.concatenate([pc, cls], axis=2)
    return out[:B].reshape(B, K, 3)


# ---------------------------------------------------------------------------
# Pure-JAX reference (mirrors the PyTorch forward)
# ---------------------------------------------------------------------------
def pc_mlp_reference(f, params, feat_channels, K, class_num, norm, eps=1e-5):
    layer_num = len(feat_channels) - 1
    x = f
    for i in range(layer_num):
        w, b = params["fc"][i]
        x = x @ w + b
        if norm:
            g, be = params["ln"][i]
            mu = jnp.mean(x, axis=-1, keepdims=True)
            var = jnp.mean((x - mu) ** 2, axis=-1, keepdims=True)
            x = (x - mu) * jax.lax.rsqrt(var + eps) * g + be
        x = jnp.where(x > 0, x, 0.2 * x)
    wf, bf = params["final"]
    pc = (x @ wf + bf).reshape(f.shape[0], K, -1)
    if class_num != 0:
        wc, bc = params["cls"]
        cls = (x @ wc + bc).reshape(f.shape[0], K, -1)
        cls = jax.nn.softmax(cls, axis=2)
        return jnp.concatenate([pc, cls], axis=2)
    return pc


# ---------------------------------------------------------------------------
if __name__ == "__main__":
    feat_channels = [32, 64, 64]
    K = 4
    class_num = 5
    norm = True
    B = 2

    key = jax.random.PRNGKey(0)
    k_param, k_input = jax.random.split(key)
    params = init_params(k_param, feat_channels, K, class_num, norm)
    f = jax.random.normal(k_input, (B, feat_channels[0]), jnp.float32)

    out = pc_mlp_forward(f, params, feat_channels, K, class_num, norm)
    out = jax.block_until_ready(out)
    ref = pc_mlp_reference(f, params, feat_channels, K, class_num, norm)
    assert out.shape == (B, K, 3 + class_num), out.shape
    assert jnp.allclose(out, ref, atol=1e-4, rtol=1e-4), \
        float(jnp.max(jnp.abs(out - ref)))

    # Also exercise the class_num == 0 path.
    params0 = init_params(k_param, feat_channels, K, 0, norm)
    out0 = jax.block_until_ready(pc_mlp_forward(f, params0, feat_channels, K, 0, norm))
    ref0 = pc_mlp_reference(f, params0, feat_channels, K, 0, norm)
    assert out0.shape == (B, K, 3), out0.shape
    assert jnp.allclose(out0, ref0, atol=1e-4, rtol=1e-4), \
        float(jnp.max(jnp.abs(out0 - ref0)))

    print("KERNEL_OK")
</pallas_src>

<mosaic_0001>
module attributes {stable_mosaic.version = 11 : i64} {
  func.func @kernel(%arg0: i32, %arg1: memref<8x32xf32, #tpu.memory_space<vmem>>, %arg2: memref<32x64xf32, #tpu.memory_space<vmem>>, %arg3: memref<1x64xf32, #tpu.memory_space<vmem>>, %arg4: memref<1x64xf32, #tpu.memory_space<vmem>>, %arg5: memref<1x64xf32, #tpu.memory_space<vmem>>, %arg6: memref<64x64xf32, #tpu.memory_space<vmem>>, %arg7: memref<1x64xf32, #tpu.memory_space<vmem>>, %arg8: memref<1x64xf32, #tpu.memory_space<vmem>>, %arg9: memref<1x64xf32, #tpu.memory_space<vmem>>, %arg10: memref<64x12xf32, #tpu.memory_space<vmem>>, %arg11: memref<1x12xf32, #tpu.memory_space<vmem>>, %arg12: memref<64x20xf32, #tpu.memory_space<vmem>>, %arg13: memref<1x20xf32, #tpu.memory_space<vmem>>, %arg14: memref<20x20xf32, #tpu.memory_space<vmem>>, %arg15: memref<8x12xf32, #tpu.memory_space<vmem>>, %arg16: memref<8x20xf32, #tpu.memory_space<vmem>>) attributes {dimension_semantics = [#tpu.dimension_semantics<parallel>], iteration_bounds = array<i64: 1>, scalar_prefetch = 0 : i64, scratch_operands = 0 : i64, tpu.core_type = #tpu.core_type<tc>, window_params = [{transform_indices = @transform_0, window_bounds = array<i64: 8, 32>}, {pipeline_mode = #tpu.pipeline_mode<synchronous>, transform_indices = @transform_1, window_bounds = array<i64: 32, 64>}, {pipeline_mode = #tpu.pipeline_mode<synchronous>, transform_indices = @transform_2, window_bounds = array<i64: 1, 64>}, {pipeline_mode = #tpu.pipeline_mode<synchronous>, transform_indices = @transform_3, window_bounds = array<i64: 1, 64>}, {pipeline_mode = #tpu.pipeline_mode<synchronous>, transform_indices = @transform_4, window_bounds = array<i64: 1, 64>}, {pipeline_mode = #tpu.pipeline_mode<synchronous>, transform_indices = @transform_5, window_bounds = array<i64: 64, 64>}, {pipeline_mode = #tpu.pipeline_mode<synchronous>, transform_indices = @transform_6, window_bounds = array<i64: 1, 64>}, {pipeline_mode = #tpu.pipeline_mode<synchronous>, transform_indices = @transform_7, window_bounds = array<i64: 1, 64>}, {pipeline_mode = #tpu.pipeline_mode<synchronous>, transform_indices = @transform_8, window_bounds = array<i64: 1, 64>}, {pipeline_mode = #tpu.pipeline_mode<synchronous>, transform_indices = @transform_9, window_bounds = array<i64: 64, 12>}, {pipeline_mode = #tpu.pipeline_mode<synchronous>, transform_indices = @transform_10, window_bounds = array<i64: 1, 12>}, {pipeline_mode = #tpu.pipeline_mode<synchronous>, transform_indices = @transform_11, window_bounds = array<i64: 64, 20>}, {pipeline_mode = #tpu.pipeline_mode<synchronous>, transform_indices = @transform_12, window_bounds = array<i64: 1, 20>}, {pipeline_mode = #tpu.pipeline_mode<synchronous>, transform_indices = @transform_13, window_bounds = array<i64: 20, 20>}, {transform_indices = @transform_14, window_bounds = array<i64: 8, 12>}, {transform_indices = @transform_15, window_bounds = array<i64: 8, 20>}]} {
    %c0 = arith.constant 0 : index
    %c0_0 = arith.constant 0 : index
    %0 = vector.load %arg1[%c0, %c0_0] : memref<8x32xf32, #tpu.memory_space<vmem>>, vector<8x32xf32>
    %c0_1 = arith.constant 0 : index
    %c0_2 = arith.constant 0 : index
    %1 = vector.load %arg2[%c0_1, %c0_2] : memref<32x64xf32, #tpu.memory_space<vmem>>, vector<32x64xf32>
    %c0_3 = arith.constant 0 : index
    %c0_4 = arith.constant 0 : index
    %2 = vector.load %arg3[%c0_3, %c0_4] : memref<1x64xf32, #tpu.memory_space<vmem>>, vector<1x64xf32>
    %cst = arith.constant dense<0.000000e+00> : vector<8x64xf32>
    %3 = tpu.matmul %0, %1, %cst {dimension_numbers = #tpu.dot_dimension_numbers<[1], [0], [0], [1], [0, 0, 1, 1], [], []>} : vector<8x32xf32>, vector<32x64xf32>, vector<8x64xf32> -> vector<8x64xf32>
    %4 = vector.broadcast %2 : vector<1x64xf32> to vector<8x64xf32>
    %5 = arith.addf %3, %4 : vector<8x64xf32>
    %c0_5 = arith.constant 0 : index
    %c0_6 = arith.constant 0 : index
    %6 = vector.load %arg4[%c0_5, %c0_6] : memref<1x64xf32, #tpu.memory_space<vmem>>, vector<1x64xf32>
    %c0_7 = arith.constant 0 : index
    %c0_8 = arith.constant 0 : index
    %7 = vector.load %arg5[%c0_7, %c0_8] : memref<1x64xf32, #tpu.memory_space<vmem>>, vector<1x64xf32>
    %cst_9 = arith.constant dense<0.000000e+00> : vector<8xf32>
    %8 = vector.multi_reduction <add>, %5, %cst_9 [1] : vector<8x64xf32> to vector<8xf32>
    %9 = vector.shape_cast %8 : vector<8xf32> to vector<8x1xf32>
    %cst_10 = arith.constant 6.400000e+01 : f32
    %10 = vector.broadcast %cst_10 : f32 to vector<8x1xf32>
    %11 = arith.divf %9, %10 : vector<8x1xf32>
    %12 = arith.mulf %5, %5 : vector<8x64xf32>
    %cst_11 = arith.constant dense<0.000000e+00> : vector<8xf32>
    %13 = vector.multi_reduction <add>, %12, %cst_11 [1] : vector<8x64xf32> to vector<8xf32>
    %14 = vector.shape_cast %13 : vector<8xf32> to vector<8x1xf32>
    %cst_12 = arith.constant 6.400000e+01 : f32
    %15 = vector.broadcast %cst_12 : f32 to vector<8x1xf32>
    %16 = arith.divf %14, %15 : vector<8x1xf32>
    %17 = arith.mulf %11, %11 : vector<8x1xf32>
    %18 = arith.subf %16, %17 : vector<8x1xf32>
    %19 = vector.broadcast %11 : vector<8x1xf32> to vector<8x64xf32>
    %20 = arith.subf %5, %19 : vector<8x64xf32>
    %cst_13 = arith.constant 9.99999974E-6 : f32
    %21 = vector.broadcast %cst_13 : f32 to vector<8x1xf32>
    %22 = arith.addf %18, %21 : vector<8x1xf32>
    %23 = math.rsqrt %22 : vector<8x1xf32>
    %24 = vector.broadcast %23 : vector<8x1xf32> to vector<8x64xf32>
    %25 = arith.mulf %20, %24 : vector<8x64xf32>
    %26 = vector.broadcast %6 : vector<1x64xf32> to vector<8x64xf32>
    %27 = arith.mulf %25, %26 : vector<8x64xf32>
    %28 = vector.broadcast %7 : vector<1x64xf32> to vector<8x64xf32>
    %29 = arith.addf %27, %28 : vector<8x64xf32>
    %cst_14 = arith.constant 2.000000e-01 : f32
    %30 = vector.broadcast %cst_14 : f32 to vector<8x64xf32>
    %31 = arith.mulf %30, %29 : vector<8x64xf32>
    %32 = arith.maximumf %29, %31 : vector<8x64xf32>
    %c0_15 = arith.constant 0 : index
    %c0_16 = arith.constant 0 : index
    %33 = vector.load %arg6[%c0_15, %c0_16] : memref<64x64xf32, #tpu.memory_space<vmem>>, vector<64x64xf32>
    %c0_17 = arith.constant 0 : index
    %c0_18 = arith.constant 0 : index
    %34 = vector.load %arg7[%c0_17, %c0_18] : memref<1x64xf32, #tpu.memory_space<vmem>>, vector<1x64xf32>
    %cst_19 = arith.constant dense<0.000000e+00> : vector<8x64xf32>
    %35 = tpu.matmul %32, %33, %cst_19 {dimension_numbers = #tpu.dot_dimension_numbers<[1], [0], [0], [1], [0, 0, 1, 1], [], []>} : vector<8x64xf32>, vector<64x64xf32>, vector<8x64xf32> -> vector<8x64xf32>
    %36 = vector.broadcast %34 : vector<1x64xf32> to vector<8x64xf32>
    %37 = arith.addf %35, %36 : vector<8x64xf32>
    %c0_20 = arith.constant 0 : index
    %c0_21 = arith.constant 0 : index
    %38 = vector.load %arg8[%c0_20, %c0_21] : memref<1x64xf32, #tpu.memory_space<vmem>>, vector<1x64xf32>
    %c0_22 = arith.constant 0 : index
    %c0_23 = arith.constant 0 : index
    %39 = vector.load %arg9[%c0_22, %c0_23] : memref<1x64xf32, #tpu.memory_space<vmem>>, vector<1x64xf32>
    %cst_24 = arith.constant dense<0.000000e+00> : vector<8xf32>
    %40 = vector.multi_reduction <add>, %37, %cst_24 [1] : vector<8x64xf32> to vector<8xf32>
    %41 = vector.shape_cast %40 : vector<8xf32> to vector<8x1xf32>
    %cst_25 = arith.constant 6.400000e+01 : f32
    %42 = vector.broadcast %cst_25 : f32 to vector<8x1xf32>
    %43 = arith.divf %41, %42 : vector<8x1xf32>
    %44 = arith.mulf %37, %37 : vector<8x64xf32>
    %cst_26 = arith.constant dense<0.000000e+00> : vector<8xf32>
    %45 = vector.multi_reduction <add>, %44, %cst_26 [1] : vector<8x64xf32> to vector<8xf32>
    %46 = vector.shape_cast %45 : vector<8xf32> to vector<8x1xf32>
    %cst_27 = arith.constant 6.400000e+01 : f32
    %47 = vector.broadcast %cst_27 : f32 to vector<8x1xf32>
    %48 = arith.divf %46, %47 : vector<8x1xf32>
    %49 = arith.mulf %43, %43 : vector<8x1xf32>
    %50 = arith.subf %48, %49 : vector<8x1xf32>
    %51 = vector.broadcast %43 : vector<8x1xf32> to vector<8x64xf32>
    %52 = arith.subf %37, %51 : vector<8x64xf32>
    %cst_28 = arith.constant 9.99999974E-6 : f32
    %53 = vector.broadcast %cst_28 : f32 to vector<8x1xf32>
    %54 = arith.addf %50, %53 : vector<8x1xf32>
    %55 = math.rsqrt %54 : vector<8x1xf32>
    %56 = vector.broadcast %55 : vector<8x1xf32> to vector<8x64xf32>
    %57 = arith.mulf %52, %56 : vector<8x64xf32>
    %58 = vector.broadcast %38 : vector<1x64xf32> to vector<8x64xf32>
    %59 = arith.mulf %57, %58 : vector<8x64xf32>
    %60 = vector.broadcast %39 : vector<1x64xf32> to vector<8x64xf32>
    %61 = arith.addf %59, %60 : vector<8x64xf32>
    %cst_29 = arith.constant 2.000000e-01 : f32
    %62 = vector.broadcast %cst_29 : f32 to vector<8x64xf32>
    %63 = arith.mulf %62, %61 : vector<8x64xf32>
    %64 = arith.maximumf %61, %63 : vector<8x64xf32>
    %c0_30 = arith.constant 0 : index
    %c0_31 = arith.constant 0 : index
    %65 = vector.load %arg10[%c0_30, %c0_31] : memref<64x12xf32, #tpu.memory_space<vmem>>, vector<64x12xf32>
    %c0_32 = arith.constant 0 : index
    %c0_33 = arith.constant 0 : index
    %66 = vector.load %arg11[%c0_32, %c0_33] : memref<1x12xf32, #tpu.memory_space<vmem>>, vector<1x12xf32>
    %cst_34 = arith.constant dense<0.000000e+00> : vector<8x12xf32>
    %67 = tpu.matmul %64, %65, %cst_34 {dimension_numbers = #tpu.dot_dimension_numbers<[1], [0], [0], [1], [0, 0, 1, 1], [], []>} : vector<8x64xf32>, vector<64x12xf32>, vector<8x12xf32> -> vector<8x12xf32>
    %68 = vector.broadcast %66 : vector<1x12xf32> to vector<8x12xf32>
    %69 = arith.addf %67, %68 : vector<8x12xf32>
    %c0_35 = arith.constant 0 : index
    %c0_36 = arith.constant 0 : index
    %70 = vector.load %arg12[%c0_35, %c0_36] : memref<64x20xf32, #tpu.memory_space<vmem>>, vector<64x20xf32>
    %c0_37 = arith.constant 0 : index
    %c0_38 = arith.constant 0 : index
    %71 = vector.load %arg13[%c0_37, %c0_38] : memref<1x20xf32, #tpu.memory_space<vmem>>, vector<1x20xf32>
    %c0_39 = arith.constant 0 : index
    %c0_40 = arith.constant 0 : index
    %72 = vector.load %arg14[%c0_39, %c0_40] : memref<20x20xf32, #tpu.memory_space<vmem>>, vector<20x20xf32>
    %cst_41 = arith.constant dense<0.000000e+00> : vector<8x20xf32>
    %73 = tpu.matmul %64, %70, %cst_41 {dimension_numbers = #tpu.dot_dimension_numbers<[1], [0], [0], [1], [0, 0, 1, 1], [], []>} : vector<8x64xf32>, vector<64x20xf32>, vector<8x20xf32> -> vector<8x20xf32>
    %74 = vector.broadcast %71 : vector<1x20xf32> to vector<8x20xf32>
    %75 = arith.addf %73, %74 : vector<8x20xf32>
    %cst_42 = arith.constant dense<0xFF800000> : vector<8xf32>
    %76 = vector.multi_reduction <maximumf>, %75, %cst_42 [1] : vector<8x20xf32> to vector<8xf32>
    %77 = vector.shape_cast %76 : vector<8xf32> to vector<8x1xf32>
    %78 = vector.broadcast %77 : vector<8x1xf32> to vector<8x20xf32>
    %79 = arith.subf %75, %78 : vector<8x20xf32>
    %80 = math.exp %79 : vector<8x20xf32>
    %cst_43 = arith.constant dense<0.000000e+00> : vector<8x20xf32>
    %81 = tpu.matmul %80, %72, %cst_43 {dimension_numbers = #tpu.dot_dimension_numbers<[1], [0], [0], [1], [0, 0, 1, 1], [], []>} : vector<8x20xf32>, vector<20x20xf32>, vector<8x20xf32> -> vector<8x20xf32>
    %82 = tpu.reciprocal %81 {approx = true} : vector<8x20xf32> -> vector<8x20xf32>
    %83 = arith.mulf %81, %82 : vector<8x20xf32>
    %cst_44 = arith.constant 2.000000e+00 : f32
    %84 = vector.broadcast %cst_44 : f32 to vector<8x20xf32>
    %85 = arith.subf %84, %83 : vector<8x20xf32>
    %86 = arith.mulf %82, %85 : vector<8x20xf32>
    %c0_45 = arith.constant 0 : index
    %c0_46 = arith.constant 0 : index
    %87 = vector.load %arg15[%c0_45, %c0_46] : memref<8x12xf32, #tpu.memory_space<vmem>>, vector<8x12xf32>
    tpu.vector_store %arg15[%c0_45, %c0_46], %69 {strides = array<i32>} : memref<8x12xf32, #tpu.memory_space<vmem>>, vector<8x12xf32>,
    %88 = arith.mulf %80, %86 : vector<8x20xf32>
    %c0_47 = arith.constant 0 : index
    %c0_48 = arith.constant 0 : index
    %89 = vector.load %arg16[%c0_47, %c0_48] : memref<8x20xf32, #tpu.memory_space<vmem>>, vector<8x20xf32>
    tpu.vector_store %arg16[%c0_47, %c0_48], %88 {strides = array<i32>} : memref<8x20xf32, #tpu.memory_space<vmem>>, vector<8x20xf32>,
    return
  }
  func.func @transform_0(%arg0: i32) -> (i32, i32) {
    %c0_i32 = arith.constant 0 : i32
    %c0_i32_0 = arith.constant 0 : i32
    return %arg0, %c0_i32 : i32, i32
  }
  func.func @transform_1(%arg0: i32) -> (i32, i32) {
    %c0_i32 = arith.constant 0 : i32
    %c0_i32_0 = arith.constant 0 : i32
    %c0_i32_1 = arith.constant 0 : i32
    return %c0_i32, %c0_i32_0 : i32, i32
  }
  func.func @transform_2(%arg0: i32) -> (i32, i32) {
    %c0_i32 = arith.constant 0 : i32
    %c0_i32_0 = arith.constant 0 : i32
    %c0_i32_1 = arith.constant 0 : i32
    return %c0_i32, %c0_i32_0 : i32, i32
  }
  func.func @transform_3(%arg0: i32) -> (i32, i32) {
    %c0_i32 = arith.constant 0 : i32
    %c0_i32_0 = arith.constant 0 : i32
    %c0_i32_1 = arith.constant 0 : i32
    return %c0_i32, %c0_i32_0 : i32, i32
  }
  func.func @transform_4(%arg0: i32) -> (i32, i32) {
    %c0_i32 = arith.constant 0 : i32
    %c0_i32_0 = arith.constant 0 : i32
    %c0_i32_1 = arith.constant 0 : i32
    return %c0_i32, %c0_i32_0 : i32, i32
  }
  func.func @transform_5(%arg0: i32) -> (i32, i32) {
    %c0_i32 = arith.constant 0 : i32
    %c0_i32_0 = arith.constant 0 : i32
    %c0_i32_1 = arith.constant 0 : i32
    return %c0_i32, %c0_i32_0 : i32, i32
  }
  func.func @transform_6(%arg0: i32) -> (i32, i32) {
    %c0_i32 = arith.constant 0 : i32
    %c0_i32_0 = arith.constant 0 : i32
    %c0_i32_1 = arith.constant 0 : i32
    return %c0_i32, %c0_i32_0 : i32, i32
  }
  func.func @transform_7(%arg0: i32) -> (i32, i32) {
    %c0_i32 = arith.constant 0 : i32
    %c0_i32_0 = arith.constant 0 : i32
    %c0_i32_1 = arith.constant 0 : i32
    return %c0_i32, %c0_i32_0 : i32, i32
  }
  func.func @transform_8(%arg0: i32) -> (i32, i32) {
    %c0_i32 = arith.constant 0 : i32
    %c0_i32_0 = arith.constant 0 : i32
    %c0_i32_1 = arith.constant 0 : i32
    return %c0_i32, %c0_i32_0 : i32, i32
  }
  func.func @transform_9(%arg0: i32) -> (i32, i32) {
    %c0_i32 = arith.constant 0 : i32
    %c0_i32_0 = arith.constant 0 : i32
    %c0_i32_1 = arith.constant 0 : i32
    return %c0_i32, %c0_i32_0 : i32, i32
  }
  func.func @transform_10(%arg0: i32) -> (i32, i32) {
    %c0_i32 = arith.constant 0 : i32
    %c0_i32_0 = arith.constant 0 : i32
    %c0_i32_1 = arith.constant 0 : i32
    return %c0_i32, %c0_i32_0 : i32, i32
  }
  func.func @transform_11(%arg0: i32) -> (i32, i32) {
    %c0_i32 = arith.constant 0 : i32
    %c0_i32_0 = arith.constant 0 : i32
    %c0_i32_1 = arith.constant 0 : i32
    return %c0_i32, %c0_i32_0 : i32, i32
  }
  func.func @transform_12(%arg0: i32) -> (i32, i32) {
    %c0_i32 = arith.constant 0 : i32
    %c0_i32_0 = arith.constant 0 : i32
    %c0_i32_1 = arith.constant 0 : i32
    return %c0_i32, %c0_i32_0 : i32, i32
  }
  func.func @transform_13(%arg0: i32) -> (i32, i32) {
    %c0_i32 = arith.constant 0 : i32
    %c0_i32_0 = arith.constant 0 : i32
    %c0_i32_1 = arith.constant 0 : i32
    return %c0_i32, %c0_i32_0 : i32, i32
  }
  func.func @transform_14(%arg0: i32) -> (i32, i32) {
    %c0_i32 = arith.constant 0 : i32
    %c0_i32_0 = arith.constant 0 : i32
    return %arg0, %c0_i32 : i32, i32
  }
  func.func @transform_15(%arg0: i32) -> (i32, i32) {
    %c0_i32 = arith.constant 0 : i32
    %c0_i32_0 = arith.constant 0 : i32
    return %arg0, %c0_i32 : i32, i32
  }
}

</mosaic_0001>

<bundles_post_ra>
// kernel: tpu_custom_call.1
= control target key start
LH: loop header
LB: loop body
LE: loop exit
PB: predicated region body
PF: predicated region fallthrough
CT: control target
= control target key end

     0   :  { %21 = vsyncpa [#allocation3], 0  ;;  %v822_v3 = vmov 0.0|0.0   ;;  %vm823_vm0 = vmmov 0   ;;  %v824_v6 = vmov 0.0   ;;  %s1087_s0 = inlined_call_operand.vmem [shape: f32[8,32], index: 0, kind: input, shape index: {}]   ;;  %s1088_s1 = inlined_call_operand.vmem [shape: f32[32,64], index: 1, kind: input, shape index: {}]   ;;  %s1089_s2 = inlined_call_operand.vmem [shape: f32[1,64], index: 2, kind: input, shape index: {}]   ;;  %s1090_s3 = inlined_call_operand.vmem [shape: f32[1,64], index: 3, kind: input, shape index: {}]   ;;  %s1091_s4 = inlined_call_operand.vmem [shape: f32[1,64], index: 4, kind: input, shape index: {}]   ;;  %s1092_s5 = inlined_call_operand.vmem [shape: f32[64,64], index: 5, kind: input, shape index: {}]   ;;  %s1093_s6 = inlined_call_operand.vmem [shape: f32[1,64], index: 6, kind: input, shape index: {}]   ;;  %s1094_s7 = inlined_call_operand.vmem [shape: f32[1,64], index: 7, kind: input, shape index: {}]   ;;  %s1095_s8 = inlined_call_operand.vmem [shape: f32[1,64], index: 8, kind: input, shape index: {}]   ;;  %s1096_s9 = inlined_call_operand.vmem [shape: f32[64,12], index: 9, kind: input, shape index: {}]   ;;  %s1097_s10 = inlined_call_operand.vmem [shape: f32[1,12], index: 10, kind: input, shape index: {}]   ;;  %s1098_s11 = inlined_call_operand.vmem [shape: f32[64,20], index: 11, kind: input, shape index: {}]   ;;  %s1099_s12 = inlined_call_operand.vmem [shape: f32[1,20], index: 12, kind: input, shape index: {}]   ;;  %s1100_s13 = inlined_call_operand.vmem [shape: f32[20,20], index: 13, kind: input, shape index: {}]   ;;  %s1101_s14 = inlined_call_operand.hbm [shape: f32[8,12], index: 14, kind: output, shape index: {0}]   ;;  %s1102_s15 = inlined_call_operand.hbm [shape: f32[8,20], index: 15, kind: output, shape index: {1}]  }
   0x1   :  { %v52_v0 = vld [vmem:[%s1088_s1] sm:$0xff]  ;;  %v53_v1 = vld [vmem:[%s1088_s1 + $0x8] sm:$0xff]  ;;  %v54_v2 = vld [vmem:[%s1088_s1 + $0x10] sm:$0xff]  ;;  %716 = vmatprep.subr.bf16.mxu0 %v822_v3  ;;  %647 = vmatprep.mubr.msk.f32.mxu0 %vm823_vm0, %v824_v6 }
   0x2   :  { %v717_v4 = vpack.c.bf16 %v53_v1, %v52_v0  ;;  %v55_v5 = vld [vmem:[%s1088_s1 + $0x18] sm:$0xff]  ;;  %722 = vmatprep.subr.bf16.mxu1 %v822_v3  ;;  %666 = vmatprep.mubr.msk.f32.mxu1 %vm823_vm0, %v824_v6 }
   0x3   :  { %22 = vsyncpa [#allocation5], 0  ;;  %v720_v7 = vpack.c.bf16 %v55_v5, %v54_v2  ;;  %v51_v8 = vld [vmem:[%s1087_s0] sm:$0xff]  ;;  %vm63_vm1 = vcmask 261120   ;;  %vm139_vm2 = vcmask 523264   ;;  %v173_v17 = vld [vmem:[%s1092_s5 + $0x8] sm:$0xff] }
   0x4   :  { %718 = vmatpush3.bf16.msra.mxu0 %v717_v4  ;;  %v589_v9 = vld [vmem:[%s1089_s2] ss:$0 sm:$0xff]  ;;  %v174_v18 = vld [vmem:[%s1092_s5 + $0x10] sm:$0xff]  ;;  %v175_v20 = vld [vmem:[%s1092_s5 + $0x18] sm:$0xff]  ;;  %vm469_vm3 = vcmask 162816   ;;  %vm557_vm4 = vcmask 97280  }
   0x5   :  { %719 = vmatprep.subr.bf16.mxu0 %v822_v3  ;;  %v172_v16 = vld [vmem:[%s1092_s5] sm:$0xff]  ;;  %v726_v21 = vpack.c.bf16 %v175_v20, %v174_v18  ;;  %v177_v23 = vld [vmem:[%s1092_s5 + $0x28] sm:$0xff]  ;;  %v178_v25 = vld [vmem:[%s1092_s5 + $0x30] sm:$0xff]  ;;  %vm479_vm5 = vcmask 1043456  }
   0x6   :  { %v723_v19 = vpack.c.bf16 %v173_v17, %v172_v16  ;;  %v176_v22 = vld [vmem:[%s1092_s5 + $0x20] sm:$0xff]  ;;  %v179_v26 = vld [vmem:[%s1092_s5 + $0x38] sm:$0xff]  ;;  %v294_v52 = vld [vmem:[%s1096_s9 + $0x8] sm:$0xff]  ;;  %s825_s5 = smov [#allocation2]  }
   0x7   :  { %v729_v24 = vpack.c.bf16 %v177_v23, %v176_v22  ;;  %v732_v27 = vpack.c.bf16 %v179_v26, %v178_v25  ;;  %v591_v37 = vld [vmem:[%s1090_s3] ss:$0 sm:$0xff]  ;;  %v382_v55 = vld [vmem:[%s1098_s11 + $0x8] sm:$0xff]  ;;  %v295_v57 = vld [vmem:[%s1096_s9 + $0x10] sm:$0xff]  ;;  %s567_s0 = sshll.u32 %s825_s5, 4  ;;  %s568_s0 = int_to_ptr.vmem [resolvable:$true] %s567_s0 }
   0x8   :  { %721 = vmatpush3.bf16.msra.mxu0 %v720_v7  ;;  %724 = vmatpush3.bf16.msra.mxu1 %v723_v19  ;;  %v592_v39 = vld [vmem:[%s1091_s4] ss:$0 sm:$0xff]  ;;  %v296_v58 = vld [vmem:[%s1096_s9 + $0x18] sm:$0xff]  ;;  %v383_v59 = vld [vmem:[%s1098_s11 + $0x10] sm:$0xff]  ;;  %s774_s29 = scalar_lea.vmem %s568_s0, 128  ;;  %p779_p1 = scmp.lt.s32.totalorder %s568_s0, %s568_s0 }
   0x9   :  { %734 = vmatprep.subr.bf16.mxu0 %v822_v3  ;;  %725 = vmatprep.subr.bf16.mxu1 %v822_v3  ;;  %v593_v44 = vld [vmem:[%s1093_s6] ss:$0 sm:$0xff]  ;;  %v738_v60 = vpack.c.bf16 %v296_v58, %v295_v57  ;;  %v384_v61 = vld [vmem:[%s1098_s11 + $0x18] sm:$0xff]  ;;  %v298_v0 = vld [vmem:[%s1096_s9 + $0x28] sm:$0xff]  ;;  %p775_p0 = scmp.ne.s32.totalorder %s568_s0, %s774_s29  ;;  %p780_p2 = scmp.lt.s32.totalorder %s774_s29, %s774_s29 }
   0xa   :  { %v293_v51 = vld [vmem:[%s1096_s9] sm:$0xff]  ;;  %v750_v62 = vpack.c.bf16 %v384_v61, %v383_v59  ;;  %v386_v4 = vld [vmem:[%s1098_s11 + $0x28] sm:$0xff]  ;;  %v299_v7 = vld [vmem:[%s1096_s9 + $0x30] sm:$0xff] }
   0xb   :  { %648 = vmatmul.mubr.msk.f32.vlgmr.msra.gmra.mrb[0].mxu0 %vm63_vm1, %v51_v8  ;;  %v381_v53 = vld [vmem:[%s1098_s11] sm:$0xff]  ;;  %v735_v54 = vpack.c.bf16 %v294_v52, %v293_v51  ;;  %v300_v8 = vld [vmem:[%s1096_s9 + $0x38] sm:$0xff]  ;;  %p781_p3 = por %p780_p2, %p779_p1 }
   0xc   :  { %685 = vmatprep.mubr.msk.f32.mxu0 %vm823_vm0, %v824_v6  ;;  %727 = vmatpush3.bf16.msra.mxu1 %v726_v21  ;;  %v747_v56 = vpack.c.bf16 %v382_v55, %v381_v53  ;;  %v297_v63 = vld [vmem:[%s1096_s9 + $0x20] sm:$0xff] }
   0xd   :  { %728 = vmatprep.subr.bf16.mxu1 %v822_v3  ;;  %736 = vmatpush3.bf16.msra.mxu0 %v735_v54  ;;  %v385_v1 = vld [vmem:[%s1098_s11 + $0x20] sm:$0xff]  ;;  %v741_v2 = vpack.c.bf16 %v298_v0, %v297_v63  ;;  %p782_p4 = pnand %p781_p3, %p775_p0 }
   0xe   :  { %737 = vmatprep.subr.bf16.mxu0 %v822_v3  ;;  %v753_v5 = vpack.c.bf16 %v386_v4, %v385_v1  ;;  %v595_v22 = vld [vmem:[%s1094_s7] ss:$0 sm:$0xff] }
  0x10   :  { %730 = vmatpush3.bf16.msra.mxu1 %v729_v24  ;;  %v596_v24 = vld [vmem:[%s1095_s8] ss:$0 sm:$0xff] }
  0x11   :  { %731 = vmatprep.subr.bf16.mxu1 %v822_v3  ;;  %739 = vmatpush3.bf16.msra.mxu0 %v738_v60 }
  0x12   :  { %740 = vmatprep.subr.bf16.mxu0 %v822_v3 }
  0x14   :  { %733 = vmatpush3.bf16.msra.mxu1 %v732_v27 }
  0x15   :  { %746 = vmatprep.subr.bf16.mxu1 %v822_v3  ;;  %742 = vmatpush3.bf16.msra.mxu0 %v741_v2 }
  0x16   :  { %743 = vmatprep.subr.bf16.mxu0 %v822_v3 }
  0xde   :  { %v133_v10 = vpop.f32.mrb[0].mxu0 }
  0xdf   :  { %v134_v11 = vadd.f32 %v589_v9, %v133_v10  ;;  %v649_v12 = vpop.f32.mrb[1].mxu0  ;;  %v387_v9 = vld [vmem:[%s1098_s11 + $0x30] sm:$0xff]  ;;  %v744_v10 = vpack.c.bf16 %v300_v8, %v299_v7 }
  0xe1   :  { %v140_v13 = vsel %vm139_vm2, %v134_v11, 0.0  ;;  %v145_v14 = vmul.f32 %v134_v11, %v134_v11  ;;  %745 = vmatpush3.bf16.msra.mxu0 %v744_v10 }
  0xe2   :  { %141 = vadd.xlane.f32.xlu0 %v140_v13  ;;  %758 = vmatprep.subr.bf16.mxu0 %v822_v3 }
  0xe3   :  { %v146_v15 = vsel %vm139_vm2, %v145_v14, 0.0 }
  0xe6   :  { %147 = vadd.xlane.f32.xlu0 %v146_v15 }
 0x16f   :  { %v142_v28 = vpop.xlane.xlu0 %141 }
 0x170   :  { %v144_v29 = vmul.f32 0.015625, %v142_v28  ;;  %v597_v28 = vld [vmem:[%s1097_s10] ss:$0 sm:$0xff] }
 0x172   :  { %v150_v31 = vmul.f32 %v144_v29, %v144_v29  ;;  %v152_v35 = vsub.f32 %v134_v11, %v144_v29  ;;  %v388_v11 = vld [vmem:[%s1098_s11 + $0x38] sm:$0xff]  ;;  %v599_v29 = vld [vmem:[%s1099_s12] ss:$0 sm:$0xff] }
 0x173   :  { %v148_v30 = vpop.xlane.xlu0 %147  ;;  %v756_v12 = vpack.c.bf16 %v388_v11, %v387_v9 }
 0x174   :  { %v149_v32 = vmul.f32 0.015625, %v148_v30 }
 0x176   :  { %v151_v33 = vsub.f32 %v149_v32, %v150_v31 }
 0x178   :  { %v153_v34 = vadd.f32 1e-05, %v151_v33 }
 0x17a   :  { %766 = vrsqrt.f32 %v153_v34 }
 0x184   :  { %v767_v36 = vpop.eup %766 }
 0x185   :  { %v155_v38 = vmul.f32 %v767_v36, %v152_v35 }
 0x187   :  { %v162_v40 = vmul.f32 %v591_v37, %v155_v38  ;;  %v390_v37 = vld [vmem:[%s1100_s13] sm:$0xff]  ;;  %v391_v38 = vld [vmem:[%s1100_s13 + $0x8] sm:$0xff] }
 0x189   :  { %v169_v41 = vadd.f32 %v592_v39, %v162_v40  ;;  %v759_v39 = vpack.c.bf16 %v391_v38, %v390_v37  ;;  %v392_v40 = vld [vmem:[%s1100_s13 + $0x10] sm:$0xf] }
 0x18b   :  { %v170_v42 = vmul.f32 0.2, %v169_v41 }
 0x18d   :  { %v171_v43 = vmax.f32 %v169_v41, %v170_v42 }
 0x18f   :  { %667 = vmatmul.mubr.msk.f32.vlgmr.msra.gmra.mrb[0].mxu1 %vm139_vm2, %v171_v43 }
 0x190   :  { %704 = vmatprep.mubr.msk.f32.mxu1 %vm823_vm0, %v824_v6  ;;  %748 = vmatpush3.bf16.msra.mxu1 %v747_v56 }
 0x191   :  { %749 = vmatprep.subr.bf16.mxu1 %v822_v3 }
 0x194   :  { %751 = vmatpush3.bf16.msra.mxu1 %v750_v62 }
 0x195   :  { %752 = vmatprep.subr.bf16.mxu1 %v822_v3 }
 0x198   :  { %754 = vmatpush3.bf16.msra.mxu1 %v753_v5 }
 0x199   :  { %755 = vmatprep.subr.bf16.mxu1 %v822_v3 }
 0x19c   :  { %757 = vmatpush3.bf16.msra.mxu1 %v756_v12 }
 0x262   :  { %v256_v45 = vpop.f32.mrb[0].mxu1 }
 0x263   :  { %v257_v46 = vadd.f32 %v593_v44, %v256_v45  ;;  %v668_v47 = vpop.f32.mrb[1].mxu1 }
 0x265   :  { %v262_v48 = vsel %vm139_vm2, %v257_v46, 0.0  ;;  %v266_v49 = vmul.f32 %v257_v46, %v257_v46 }
 0x266   :  { %263 = vadd.xlane.f32.xlu1 %v262_v48 }
 0x267   :  { %v267_v50 = vsel %vm139_vm2, %v266_v49, 0.0 }
 0x26a   :  { %268 = vadd.xlane.f32.xlu1 %v267_v50 }
 0x2f3   :  { %v264_v13 = vpop.xlane.xlu1 %263 }
 0x2f4   :  { %v265_v14 = vmul.f32 0.015625, %v264_v13 }
 0x2f6   :  { %v271_v16 = vmul.f32 %v265_v14, %v265_v14  ;;  %v273_v20 = vsub.f32 %v257_v46, %v265_v14 }
 0x2f7   :  { %v269_v15 = vpop.xlane.xlu1 %268 }
 0x2f8   :  { %v270_v17 = vmul.f32 0.015625, %v269_v15 }
 0x2fa   :  { %v272_v18 = vsub.f32 %v270_v17, %v271_v16 }
 0x2fc   :  { %v274_v19 = vadd.f32 1e-05, %v272_v18 }
 0x2fe   :  { %768 = vrsqrt.f32 %v274_v19 }
 0x308   :  { %v769_v21 = vpop.eup %768 }
 0x309   :  { %v276_v23 = vmul.f32 %v769_v21, %v273_v20 }
 0x30b   :  { %v283_v3 = vmul.f32 %v595_v22, %v276_v23 }
 0x30d   :  { %v290_v25 = vadd.f32 %v596_v24, %v283_v3 }
 0x30f   :  { %v291_v26 = vmul.f32 0.2, %v290_v25 }
 0x311   :  { %v292_v27 = vmax.f32 %v290_v25, %v291_v26 }
 0x313   :  { %686 = vmatmul.mubr.msk.f32.vlgmr.msra.gmra.mrb[2].mxu0 %vm139_vm2, %v292_v27  ;;  %705 = vmatmul.mubr.msk.f32.vlgmr.msra.gmra.mrb[2].mxu1 %vm139_vm2, %v292_v27 }
 0x314   :  { %713 = vmatprep.mubr.msk.f32.mxu0 %vm823_vm0, %v824_v6  ;;  %760 = vmatpush3.bf16.msra.mxu0 %v759_v39 }
 0x315   :  { %711 = vmatprep.subr.mxu0 %v824_v6 }
 0x318   :  { %712 = vmatpush3.msk.msra.mxu0 %vm479_vm5, %v392_v40 }
 0x3e6   :  { %v377_v30 = vpop.f32.mrb[2].mxu0  ;;  %v465_v31 = vpop.f32.mrb[2].mxu1 }
 0x3e7   :  { %v378_v32 = vadd.f32 %v597_v28, %v377_v30  ;;  %v466_v33 = vadd.f32 %v599_v29, %v465_v31  ;;  %v687_v34 = vpop.f32.mrb[3].mxu0  ;;  %v706_v35 = vpop.f32.mrb[3].mxu1 }
 0x3e9   :  { %v470_v36 = vsel %vm469_vm3, %v466_v33, -inf  ;;  %558 = vst.msk [vmem:[#allocation2] sm:$0xff] %vm557_vm4, %v378_v32 }
 0x3ea   :  { %471 = vmax.xlane.f32.xlu0 %v470_v36 }
 0x477   :  { %v472_v41 = vpop.xlane.xlu0 %471 }
 0x478   :  { %v473_v42 = vsub.f32 %v466_v33, %v472_v41 }
 0x47a   :  { %v474_v43 = vmul.f32 1.442695, %v473_v42 }
 0x47c   :  { %770 = vpow2.f32 %v474_v43 }
 0x486   :  { %v771_v44 = vpop.eup %770 }
 0x487   :  { %714 = vmatmul.mubr.msk.f32.vlgmr.msra.gmra.mrb[4].mxu0 %vm469_vm3, %v771_v44 }
 0x488   :  { %785 = shalt.err (!%p782_p4)
}
 0x489   :  { %s786_s3 = scalar_lea.hbm %s1101_s14, 128 }
 0x48a   :  { %p787_p5 = scmp.ne.s32.totalorder %s1101_s14, %s786_s3  ;;  %p790_p6 = scmp.lt.u32.totalorder %s786_s3, %s1101_s14 }
 0x48c   :  { %p792_p7 = pnand %p790_p6, %p787_p5 }
 0x48e   :  { %795 = shalt.err (!%p792_p7)
}
 0x48f   :  { %570 = dma.vmem_to_hbm [thread:$0]  %s568_s0, 128, %s1101_s14, [#allocation3]  }
 0x490   :  { %s826_s19 = smov [#allocation4]  }
 0x491   :  { %s577_s20 = sshll.u32 %s826_s19, 4  ;;  %s578_s20 = int_to_ptr.vmem [resolvable:$true] %s577_s20 }
 0x492   :  { %s796_s21 = scalar_lea.vmem %s578_s20, 128  ;;  %p801_p9 = scmp.lt.s32.totalorder %s578_s20, %s578_s20 }
 0x493   :  { %p797_p8 = scmp.ne.s32.totalorder %s578_s20, %s796_s21  ;;  %p802_p10 = scmp.lt.s32.totalorder %s796_s21, %s796_s21 }
 0x495   :  { %p803_p11 = por %p802_p10, %p801_p9 }
 0x497   :  { %p804_p12 = pnand %p803_p11, %p797_p8 }
 0x55a   :  { %v549_v6 = vpop.f32.mrb[4].mxu0 }
 0x55b   :  { %772 = vrcp.f32 %v549_v6  ;;  %v715_v45 = vpop.f32.mrb[5].mxu0 }
 0x565   :  { %v773_v46 = vpop.eup %772 }
 0x566   :  { %v554_v47 = vmul.f32 %v773_v46, %v549_v6 }
 0x568   :  { %v555_v48 = vsub.f32 2.0, %v554_v47 }
 0x56a   :  { %v556_v49 = vmul.f32 %v773_v46, %v555_v48 }
 0x56c   :  { %v559_v50 = vmul.f32 %v771_v44, %v556_v49 }
 0x56e   :  { %560 = vst.msk [vmem:[#allocation4] sm:$0xff] %vm469_vm3, %v559_v50 }
 0x56f   :  { %807 = shalt.err (!%p804_p12)
}
 0x570   :  { %s808_s11 = scalar_lea.hbm %s1102_s15, 128 }
 0x571   :  { %p809_p13 = scmp.ne.s32.totalorder %s1102_s15, %s808_s11  ;;  %p812_p0 = scmp.lt.u32.totalorder %s808_s11, %s1102_s15 }
 0x573   :  { %p814_p1 = pnand %p812_p0, %p809_p13 }
 0x575   :  { %817 = shalt.err (!%p814_p1)
}
 0x576   :  { %580 = dma.vmem_to_hbm [thread:$0]  %s578_s20, 128, %s1102_s15, [#allocation5]  }
 0x577   :  { %818 = dma.done.wait [#allocation3], 128  }
 0x578   :  { %819 = vsyncadd [#allocation3], 4294967168 }
 0x579   :  { %820 = dma.done.wait [#allocation5], 128  }
 0x57a   :  { %821 = vsyncadd [#allocation5], 4294967168 }
 0x57b   :  { %587 = vsyncpa [#allocation3], 1 }
 0x57c   :  { %588 = vsyncpa [#allocation5], 1 }

</bundles_post_ra>
